<compile_context>
chip_gen: v6e
topology: v6e:2x2x1
jax: 0.10.0
libtpu: 0.0.40
codegen_flags: <defaults>
</compile_context>

<pallas_src>
import jax
import jax.numpy as jnp
from jax.experimental import pallas as pl
from jax.experimental.pallas import tpu as pltpu


def _round_up(x, m):
    return ((x + m - 1) // m) * m


def _net_kernel(x_ref,
                w1_ref, b1_ref,
                w2_ref, b2_ref,
                w3_ref, b3_ref,
                w4_ref, b4_ref,
                wq_ref, bq_ref,
                out_ref):
    """Fused 4x(Linear+ReLU) + final Linear for one batch tile.

    Weights are bf16 (MXU inputs), accumulation and bias/ReLU are f32.
    """

    def linear(h, w_ref, b_ref):
        y = jnp.dot(h.astype(jnp.bfloat16), w_ref[...],
                    preferred_element_type=jnp.float32)
        return y + b_ref[...]          # bias is (1, out) -> broadcasts over rows

    h = x_ref[...]                                     # (TM, S) f32
    h = jnp.maximum(linear(h, w1_ref, b1_ref), 0.0)
    h = jnp.maximum(linear(h, w2_ref, b2_ref), 0.0)
    h = jnp.maximum(linear(h, w3_ref, b3_ref), 0.0)
    h = jnp.maximum(linear(h, w4_ref, b4_ref), 0.0)
    out_ref[...] = linear(h, wq_ref, bq_ref)           # (TM, A_pad) f32, lane-dense


def _resident_spec(shape):
    """Constant-index BlockSpec (same block every grid step -> fetched once).

    `shape` is captured by value here, avoiding the late-binding-lambda bug.
    """
    return pl.BlockSpec(shape, lambda i: (0, 0))


def net_forward(obs, params, *, tm=512):
    """obs: (B, state_dim) f32. params: bf16 (in,out) weights, f32 (1,out) biases."""
    B, S = obs.shape
    A = params["wq"].shape[1]

    # Batch tile: large when the batch is large (amortize per-step overhead),
    # but never bigger than the (8-aligned) batch itself.
    TM = min(tm, _round_up(B, 8))
    B_pad = _round_up(B, TM)
    if B_pad != B:
        obs = jnp.pad(obs, ((0, B_pad - B), (0, 0)))

    # Lane-dense output: pad action dim up to a multiple of 128 and slice later.
    A_pad = _round_up(A, 128)
    wq, bq = params["wq"], params["bq"]
    if A_pad != A:
        wq = jnp.pad(wq, ((0, 0), (0, A_pad - A)))
        bq = jnp.pad(bq, ((0, 0), (0, A_pad - A)))

    args = (obs,
            params["w1"], params["b1"],
            params["w2"], params["b2"],
            params["w3"], params["b3"],
            params["w4"], params["b4"],
            wq, bq)

    in_specs = [pl.BlockSpec((TM, S), lambda i: (i, 0))]       # batch-blocked obs
    for a in args[1:]:
        in_specs.append(_resident_spec(a.shape))                # weights/biases resident

    out = pl.pallas_call(
        _net_kernel,
        grid=(pl.cdiv(B_pad, TM),),
        in_specs=in_specs,
        out_specs=pl.BlockSpec((TM, A_pad), lambda i: (i, 0)),
        out_shape=jax.ShapeDtypeStruct((B_pad, A_pad), jnp.float32),
        compiler_params=pltpu.CompilerParams(
            dimension_semantics=("parallel",)),                 # megacore on v7x
    )(*args)

    return out[:B, :A]


def init_params(key, state_dim, action_dim, hidden_dim):
    """Weights (in,out) in bf16, biases (1,out) in f32; nn.Linear-style uniform init."""
    dims = [(state_dim, hidden_dim),
            (hidden_dim, hidden_dim),
            (hidden_dim, hidden_dim),
            (hidden_dim, hidden_dim),
            (hidden_dim, action_dim)]
    names = ["1", "2", "3", "4", "q"]
    params = {}
    for name, (d_in, d_out) in zip(names, dims):
        key, kw, kb = jax.random.split(key, 3)
        bound = 1.0 / (d_in ** 0.5)
        w = jax.random.uniform(kw, (d_in, d_out), jnp.float32, -bound, bound)
        b = jax.random.uniform(kb, (1, d_out), jnp.float32, -bound, bound)
        params[f"w{name}"] = w.astype(jnp.bfloat16)
        params[f"b{name}"] = b
    return params


def net_forward_ref(obs, params):
    """Pure-JAX reference mirroring the kernel's precision policy
    (bf16 MXU inputs, f32 accumulation, f32 bias/ReLU)."""
    h = obs
    for name in ["1", "2", "3", "4"]:
        y = jnp.dot(h.astype(jnp.bfloat16), params[f"w{name}"],
                    preferred_element_type=jnp.float32) + params[f"b{name}"]
        h = jnp.maximum(y, 0.0)
    return jnp.dot(h.astype(jnp.bfloat16), params["wq"],
                   preferred_element_type=jnp.float32) + params["bq"]


if __name__ == "__main__":
    batch = 50            # deliberately not tile-aligned: exercises batch padding
    state_dim = 16
    action_dim = 8
    hidden_dim = 256      # module default

    key = jax.random.PRNGKey(0)
    key, k_obs = jax.random.split(key)
    obs = jax.random.normal(k_obs, (batch, state_dim), jnp.float32)
    params = init_params(key, state_dim, action_dim, hidden_dim)

    # tm=32 -> TM=32, B_pad=64, grid=(2,): exercises multi-tile pipelining with
    # weights resident across grid steps.
    q = net_forward(obs, params, tm=32)
    q = jax.block_until_ready(q)

    q_ref = net_forward_ref(obs, params)
    assert q.shape == (batch, action_dim)
    assert jnp.allclose(q, q_ref, atol=1e-3, rtol=1e-3), \
        float(jnp.max(jnp.abs(q - q_ref)))

    print("KERNEL_OK")
</pallas_src>

<mosaic_0001>
module attributes {stable_mosaic.version = 11 : i64} {
  func.func @_net_kernel(%arg0: i32, %arg1: memref<32x16xf32, #tpu.memory_space<vmem>>, %arg2: memref<16x256xbf16, #tpu.memory_space<vmem>>, %arg3: memref<1x256xf32, #tpu.memory_space<vmem>>, %arg4: memref<256x256xbf16, #tpu.memory_space<vmem>>, %arg5: memref<1x256xf32, #tpu.memory_space<vmem>>, %arg6: memref<256x256xbf16, #tpu.memory_space<vmem>>, %arg7: memref<1x256xf32, #tpu.memory_space<vmem>>, %arg8: memref<256x256xbf16, #tpu.memory_space<vmem>>, %arg9: memref<1x256xf32, #tpu.memory_space<vmem>>, %arg10: memref<256x128xbf16, #tpu.memory_space<vmem>>, %arg11: memref<1x128xf32, #tpu.memory_space<vmem>>, %arg12: memref<32x128xf32, #tpu.memory_space<vmem>>) attributes {dimension_semantics = [#tpu.dimension_semantics<parallel>], iteration_bounds = array<i64: 2>, scalar_prefetch = 0 : i64, scratch_operands = 0 : i64, tpu.core_type = #tpu.core_type<tc>, window_params = [{transform_indices = @transform_0, window_bounds = array<i64: 32, 16>}, {pipeline_mode = #tpu.pipeline_mode<synchronous>, transform_indices = @transform_1, window_bounds = array<i64: 16, 256>}, {pipeline_mode = #tpu.pipeline_mode<synchronous>, transform_indices = @transform_2, window_bounds = array<i64: 1, 256>}, {pipeline_mode = #tpu.pipeline_mode<synchronous>, transform_indices = @transform_3, window_bounds = array<i64: 256, 256>}, {pipeline_mode = #tpu.pipeline_mode<synchronous>, transform_indices = @transform_4, window_bounds = array<i64: 1, 256>}, {pipeline_mode = #tpu.pipeline_mode<synchronous>, transform_indices = @transform_5, window_bounds = array<i64: 256, 256>}, {pipeline_mode = #tpu.pipeline_mode<synchronous>, transform_indices = @transform_6, window_bounds = array<i64: 1, 256>}, {pipeline_mode = #tpu.pipeline_mode<synchronous>, transform_indices = @transform_7, window_bounds = array<i64: 256, 256>}, {pipeline_mode = #tpu.pipeline_mode<synchronous>, transform_indices = @transform_8, window_bounds = array<i64: 1, 256>}, {pipeline_mode = #tpu.pipeline_mode<synchronous>, transform_indices = @transform_9, window_bounds = array<i64: 256, 128>}, {pipeline_mode = #tpu.pipeline_mode<synchronous>, transform_indices = @transform_10, window_bounds = array<i64: 1, 128>}, {transform_indices = @transform_11, window_bounds = array<i64: 32, 128>}]} {
    %c0 = arith.constant 0 : index
    %c0_0 = arith.constant 0 : index
    %0 = vector.load %arg1[%c0, %c0_0] : memref<32x16xf32, #tpu.memory_space<vmem>>, vector<32x16xf32>
    %1 = arith.truncf %0 : vector<32x16xf32> to vector<32x16xbf16>
    %c0_1 = arith.constant 0 : index
    %c0_2 = arith.constant 0 : index
    %2 = vector.load %arg2[%c0_1, %c0_2] : memref<16x256xbf16, #tpu.memory_space<vmem>>, vector<16x256xbf16>
    %cst = arith.constant dense<0.000000e+00> : vector<32x256xf32>
    %3 = tpu.matmul %1, %2, %cst {dimension_numbers = #tpu.dot_dimension_numbers<[1], [0], [0], [1], [0, 0, 1, 1], [], []>} : vector<32x16xbf16>, vector<16x256xbf16>, vector<32x256xf32> -> vector<32x256xf32>
    %c0_3 = arith.constant 0 : index
    %c0_4 = arith.constant 0 : index
    %4 = vector.load %arg3[%c0_3, %c0_4] : memref<1x256xf32, #tpu.memory_space<vmem>>, vector<1x256xf32>
    %5 = vector.broadcast %4 : vector<1x256xf32> to vector<32x256xf32>
    %6 = arith.addf %3, %5 : vector<32x256xf32>
    %cst_5 = arith.constant 0.000000e+00 : f32
    %7 = vector.broadcast %cst_5 : f32 to vector<32x256xf32>
    %8 = arith.maximumf %6, %7 : vector<32x256xf32>
    %9 = arith.truncf %8 : vector<32x256xf32> to vector<32x256xbf16>
    %c0_6 = arith.constant 0 : index
    %c0_7 = arith.constant 0 : index
    %10 = vector.load %arg4[%c0_6, %c0_7] : memref<256x256xbf16, #tpu.memory_space<vmem>>, vector<256x256xbf16>
    %cst_8 = arith.constant dense<0.000000e+00> : vector<32x256xf32>
    %11 = tpu.matmul %9, %10, %cst_8 {dimension_numbers = #tpu.dot_dimension_numbers<[1], [0], [0], [1], [0, 0, 1, 1], [], []>} : vector<32x256xbf16>, vector<256x256xbf16>, vector<32x256xf32> -> vector<32x256xf32>
    %c0_9 = arith.constant 0 : index
    %c0_10 = arith.constant 0 : index
    %12 = vector.load %arg5[%c0_9, %c0_10] : memref<1x256xf32, #tpu.memory_space<vmem>>, vector<1x256xf32>
    %13 = vector.broadcast %12 : vector<1x256xf32> to vector<32x256xf32>
    %14 = arith.addf %11, %13 : vector<32x256xf32>
    %cst_11 = arith.constant 0.000000e+00 : f32
    %15 = vector.broadcast %cst_11 : f32 to vector<32x256xf32>
    %16 = arith.maximumf %14, %15 : vector<32x256xf32>
    %17 = arith.truncf %16 : vector<32x256xf32> to vector<32x256xbf16>
    %c0_12 = arith.constant 0 : index
    %c0_13 = arith.constant 0 : index
    %18 = vector.load %arg6[%c0_12, %c0_13] : memref<256x256xbf16, #tpu.memory_space<vmem>>, vector<256x256xbf16>
    %cst_14 = arith.constant dense<0.000000e+00> : vector<32x256xf32>
    %19 = tpu.matmul %17, %18, %cst_14 {dimension_numbers = #tpu.dot_dimension_numbers<[1], [0], [0], [1], [0, 0, 1, 1], [], []>} : vector<32x256xbf16>, vector<256x256xbf16>, vector<32x256xf32> -> vector<32x256xf32>
    %c0_15 = arith.constant 0 : index
    %c0_16 = arith.constant 0 : index
    %20 = vector.load %arg7[%c0_15, %c0_16] : memref<1x256xf32, #tpu.memory_space<vmem>>, vector<1x256xf32>
    %21 = vector.broadcast %20 : vector<1x256xf32> to vector<32x256xf32>
    %22 = arith.addf %19, %21 : vector<32x256xf32>
    %cst_17 = arith.constant 0.000000e+00 : f32
    %23 = vector.broadcast %cst_17 : f32 to vector<32x256xf32>
    %24 = arith.maximumf %22, %23 : vector<32x256xf32>
    %25 = arith.truncf %24 : vector<32x256xf32> to vector<32x256xbf16>
    %c0_18 = arith.constant 0 : index
    %c0_19 = arith.constant 0 : index
    %26 = vector.load %arg8[%c0_18, %c0_19] : memref<256x256xbf16, #tpu.memory_space<vmem>>, vector<256x256xbf16>
    %cst_20 = arith.constant dense<0.000000e+00> : vector<32x256xf32>
    %27 = tpu.matmul %25, %26, %cst_20 {dimension_numbers = #tpu.dot_dimension_numbers<[1], [0], [0], [1], [0, 0, 1, 1], [], []>} : vector<32x256xbf16>, vector<256x256xbf16>, vector<32x256xf32> -> vector<32x256xf32>
    %c0_21 = arith.constant 0 : index
    %c0_22 = arith.constant 0 : index
    %28 = vector.load %arg9[%c0_21, %c0_22] : memref<1x256xf32, #tpu.memory_space<vmem>>, vector<1x256xf32>
    %29 = vector.broadcast %28 : vector<1x256xf32> to vector<32x256xf32>
    %30 = arith.addf %27, %29 : vector<32x256xf32>
    %cst_23 = arith.constant 0.000000e+00 : f32
    %31 = vector.broadcast %cst_23 : f32 to vector<32x256xf32>
    %32 = arith.maximumf %30, %31 : vector<32x256xf32>
    %33 = arith.truncf %32 : vector<32x256xf32> to vector<32x256xbf16>
    %c0_24 = arith.constant 0 : index
    %c0_25 = arith.constant 0 : index
    %34 = vector.load %arg10[%c0_24, %c0_25] : memref<256x128xbf16, #tpu.memory_space<vmem>>, vector<256x128xbf16>
    %cst_26 = arith.constant dense<0.000000e+00> : vector<32x128xf32>
    %35 = tpu.matmul %33, %34, %cst_26 {dimension_numbers = #tpu.dot_dimension_numbers<[1], [0], [0], [1], [0, 0, 1, 1], [], []>} : vector<32x256xbf16>, vector<256x128xbf16>, vector<32x128xf32> -> vector<32x128xf32>
    %c0_27 = arith.constant 0 : index
    %c0_28 = arith.constant 0 : index
    %36 = vector.load %arg11[%c0_27, %c0_28] : memref<1x128xf32, #tpu.memory_space<vmem>>, vector<1x128xf32>
    %37 = vector.broadcast %36 : vector<1x128xf32> to vector<32x128xf32>
    %38 = arith.addf %35, %37 : vector<32x128xf32>
    %c0_29 = arith.constant 0 : index
    %c0_30 = arith.constant 0 : index
    %39 = vector.load %arg12[%c0_29, %c0_30] : memref<32x128xf32, #tpu.memory_space<vmem>>, vector<32x128xf32>
    tpu.vector_store %arg12[%c0_29, %c0_30], %38 {strides = array<i32>} : memref<32x128xf32, #tpu.memory_space<vmem>>, vector<32x128xf32>,
    return
  }
  func.func @transform_0(%arg0: i32) -> (i32, i32) {
    %c0_i32 = arith.constant 0 : i32
    %c0_i32_0 = arith.constant 0 : i32
    return %arg0, %c0_i32 : i32, i32
  }
  func.func @transform_1(%arg0: i32) -> (i32, i32) {
    %c0_i32 = arith.constant 0 : i32
    %c0_i32_0 = arith.constant 0 : i32
    %c0_i32_1 = arith.constant 0 : i32
    return %c0_i32, %c0_i32_0 : i32, i32
  }
  func.func @transform_2(%arg0: i32) -> (i32, i32) {
    %c0_i32 = arith.constant 0 : i32
    %c0_i32_0 = arith.constant 0 : i32
    %c0_i32_1 = arith.constant 0 : i32
    return %c0_i32, %c0_i32_0 : i32, i32
  }
  func.func @transform_3(%arg0: i32) -> (i32, i32) {
    %c0_i32 = arith.constant 0 : i32
    %c0_i32_0 = arith.constant 0 : i32
    %c0_i32_1 = arith.constant 0 : i32
    return %c0_i32, %c0_i32_0 : i32, i32
  }
  func.func @transform_4(%arg0: i32) -> (i32, i32) {
    %c0_i32 = arith.constant 0 : i32
    %c0_i32_0 = arith.constant 0 : i32
    %c0_i32_1 = arith.constant 0 : i32
    return %c0_i32, %c0_i32_0 : i32, i32
  }
  func.func @transform_5(%arg0: i32) -> (i32, i32) {
    %c0_i32 = arith.constant 0 : i32
    %c0_i32_0 = arith.constant 0 : i32
    %c0_i32_1 = arith.constant 0 : i32
    return %c0_i32, %c0_i32_0 : i32, i32
  }
  func.func @transform_6(%arg0: i32) -> (i32, i32) {
    %c0_i32 = arith.constant 0 : i32
    %c0_i32_0 = arith.constant 0 : i32
    %c0_i32_1 = arith.constant 0 : i32
    return %c0_i32, %c0_i32_0 : i32, i32
  }
  func.func @transform_7(%arg0: i32) -> (i32, i32) {
    %c0_i32 = arith.constant 0 : i32
    %c0_i32_0 = arith.constant 0 : i32
    %c0_i32_1 = arith.constant 0 : i32
    return %c0_i32, %c0_i32_0 : i32, i32
  }
  func.func @transform_8(%arg0: i32) -> (i32, i32) {
    %c0_i32 = arith.constant 0 : i32
    %c0_i32_0 = arith.constant 0 : i32
    %c0_i32_1 = arith.constant 0 : i32
    return %c0_i32, %c0_i32_0 : i32, i32
  }
  func.func @transform_9(%arg0: i32) -> (i32, i32) {
    %c0_i32 = arith.constant 0 : i32
    %c0_i32_0 = arith.constant 0 : i32
    %c0_i32_1 = arith.constant 0 : i32
    return %c0_i32, %c0_i32_0 : i32, i32
  }
  func.func @transform_10(%arg0: i32) -> (i32, i32) {
    %c0_i32 = arith.constant 0 : i32
    %c0_i32_0 = arith.constant 0 : i32
    %c0_i32_1 = arith.constant 0 : i32
    return %c0_i32, %c0_i32_0 : i32, i32
  }
  func.func @transform_11(%arg0: i32) -> (i32, i32) {
    %c0_i32 = arith.constant 0 : i32
    %c0_i32_0 = arith.constant 0 : i32
    return %arg0, %c0_i32 : i32, i32
  }
}

</mosaic_0001>

<bundles_post_ra>
// kernel: tpu_custom_call.1
= control target key start
LH: loop header
LB: loop body
LE: loop exit
PB: predicated region body
PF: predicated region fallthrough
CT: control target
= control target key end

     0   :  { %16 = vsyncpa [#allocation3], 0  ;;  %s2525_s0 = inlined_call_operand.vmem [shape: f32[64,16], index: 0, kind: input, shape index: {}]   ;;  %s2526_s1 = inlined_call_operand.vmem [shape: bf16[16,256], index: 1, kind: input, shape index: {}]   ;;  %s2527_s2 = inlined_call_operand.vmem [shape: f32[1,256], index: 2, kind: input, shape index: {}]   ;;  %s2528_s3 = inlined_call_operand.hbm [shape: bf16[256,256], index: 3, kind: input, shape index: {}]   ;;  %s2529_s4 = inlined_call_operand.vmem [shape: f32[1,256], index: 4, kind: input, shape index: {}]   ;;  %s2530_s5 = inlined_call_operand.hbm [shape: bf16[256,256], index: 5, kind: input, shape index: {}]   ;;  %s2531_s6 = inlined_call_operand.vmem [shape: f32[1,256], index: 6, kind: input, shape index: {}]   ;;  %s2532_s7 = inlined_call_operand.hbm [shape: bf16[256,256], index: 7, kind: input, shape index: {}]   ;;  %s2533_s8 = inlined_call_operand.vmem [shape: f32[1,256], index: 8, kind: input, shape index: {}]   ;;  %s2534_s9 = inlined_call_operand.hbm [shape: bf16[256,128], index: 9, kind: input, shape index: {}]   ;;  %s2535_s10 = inlined_call_operand.vmem [shape: f32[1,128], index: 10, kind: input, shape index: {}]   ;;  %s2536_s11 = inlined_call_operand.hbm [shape: f32[64,128], index: 11, kind: output, shape index: {}]  }
   0x1   :  { %17 = vsyncpa [#allocation6], 0 }
   0x2   :  { %18 = vsyncpa [#allocation9], 0 }
   0x3   :  { %19 = vsyncpa [#allocation4], 0 }
   0x4   :  { %21 = vsyncpa [#allocation4 + $0x1], 0  ;;  %s2328_s17 = smov 0   ;;  %s2330_s18 = smov 0  }
   0x5   :  { %s2332_s19 = smov 0   ;;  %s2334_s20 = smov 0  }
   0x6 LB: > { %2540 = sst [smem:[#allocation15_spill]] %s2250_s19  ;;  %s2349_s21 = sadd.s32 4294967295, %s2254_s20   ;;  %s2254_s20 = sphi %s2334_s20, %s2559_s20   ;;  %s2250_s19 = sphi %s2332_s19, %s2558_s19   ;;  %s2246_s18 = sphi %s2330_s18, %s2557_s18   ;;  %s2242_s17 = sphi %s2328_s17, %s2556_s17  }
   0x7   : > { %s1662_s22 = sadd.s32 4294967294, %s2254_s20   ;;  %s2353_s23 = sadd.s32 1, %s2254_s20  }
   0x8   : > { %s270_s24 = sadd.s32 1, %s2250_s19  ;;  %s267_s25 = ssub.s32 %s2254_s20, %s2353_s23 }
   0x9   : > { %p280_p0 = scmp.ne.s32.totalorder %s2250_s19, %s2246_s18  ;;  %p268_p1 = scmp.eq.s32.totalorder %s267_s25, 0 }
   0xa   : > { %p281_p2 = scmp.eq.s32.totalorder %s2349_s21, 1  ;;  %p286_p3 = scmp.ne.s32.totalorder %s2246_s18, %s2242_s17 }
   0xb   : > { %p287_p4 = scmp.eq.s32.totalorder %s1662_s22, 1  ;;  %p1663_p7 = scmp.ge.s32.totalorder %s2254_s20, 1 }
   0xc   : > { %s2364_s26 = scalar_select %p268_p1, %s2250_s19, %s270_s24  }
   0xd   : > { %p2366_p5 = por %p281_p2, %p280_p0  ;;  %p2370_p6 = por %p287_p4, %p286_p3 }
   0xe   : > { %2541 = sst [smem:[#allocation16_spill]] %s2364_s26  ;;  %p294_p8 = scmp.lt.s32.totalorder %s2254_s20, 3 }
   0xf   : > { %s2542_s27 = scalar_select %p2366_p5, 1, 0 }
  0x10   : > { %s2543_s28 = scalar_select %p2370_p6, 1, 0 }
  0x11   : > { %p2537_p9 = scmp.eq.s32.totalorder %s2349_s21, 0  ;;  %p2377_p10 = pnand %p1663_p7, %p294_p8 }
  0x12   : > { %s2256_s30 = smov [#allocation5]   ;;  %s2257_s14 = smov [#allocation2]  }
  0x13   : > { %p1846_p11 = pneg %p2377_p10  ;;  %s328_s12 = sshll.u32 %s2256_s30, 4  ;;  %s329_s12 = int_to_ptr.vmem [resolvable:$true] %s328_s12 }
  0x14   : > { %s312_s15 = sshll.u32 %s2257_s14, 4  ;;  %s2258_s16 = smov [#allocation7]   ;;  %s313_s15 = int_to_ptr.vmem [resolvable:$true] %s312_s15 }
  0x15   : > { %p2385_p12 = pnand %p2537_p9, %p1846_p11  ;;  %s344_s22 = sshll.u32 %s2258_s16, 4  ;;  %s345_s22 = int_to_ptr.vmem [resolvable:$true] %s344_s22 }
  0x16   : > { %s2089_s24 = scalar_lea.vmem %s329_s12, 4096  ;;  %p2097_p3 = scmp.lt.s32.totalorder %s329_s12, %s329_s12 }
  0x17   : > { %p2080_p13 = pneg %p2385_p12  ;;  %p2090_p0 = scmp.ne.s32.totalorder %s329_s12, %s2089_s24 }
  0x18   : > { %p2098_p4 = scmp.lt.s32.totalorder %s2089_s24, %s2089_s24 }
  0x19   : > { %p2092_p1 = pnand %p2090_p0, %p2080_p13 }
  0x1a   : > { %p2099_p7 = por %p2098_p4, %p2097_p3 }
  0x1b   : > { %p2093_p2 = pneg %p2092_p1 }
  0x1d   : > { %p2100_p8 = pnand %p2099_p7, %p2093_p2 }
  0x1f   : > { %2103 = shalt.err (!%p2100_p8)
}
  0x20   : > { %s2259_s25 = smov 128   ;;  %s2260_s30 = smov 8  }
  0x21   : > { %1852 = dma.hbm_to_vmem [thread:$0]  (!%p2385_p12), %s2530_s5, 4096, %s329_s12, [#allocation6], %s2259_s25, %s2259_s25, %s2260_s30  }
  0x22   : > { %s2115_s26 = scalar_lea.vmem %s313_s15, 4096  ;;  %p2123_p9 = scmp.lt.s32.totalorder %s313_s15, %s313_s15 }
  0x23   : > { %p2116_p11 = scmp.ne.s32.totalorder %s313_s15, %s2115_s26  ;;  %p2124_p6 = scmp.lt.s32.totalorder %s2115_s26, %s2115_s26 }
  0x25   : > { %p2118_p0 = pnand %p2116_p11, %p2080_p13  ;;  %p2125_p3 = por %p2124_p6, %p2123_p9 }
  0x27   : > { %p2119_p1 = pneg %p2118_p0 }
  0x29   : > { %p2126_p2 = pnand %p2125_p3, %p2119_p1 }
  0x2b   : > { %2129 = shalt.err (!%p2126_p2)
}
  0x2c   : > { %1849 = dma.hbm_to_vmem [thread:$0]  (!%p2385_p12), %s2528_s3, 4096, %s313_s15, [#allocation3], %s2259_s25, %s2259_s25, %s2260_s30  }
  0x2d   : > { %s2141_s12 = scalar_lea.vmem %s345_s22, 4096  ;;  %p2149_p11 = scmp.lt.s32.totalorder %s345_s22, %s345_s22 }
  0x2e   : > { %p2142_p4 = scmp.ne.s32.totalorder %s345_s22, %s2141_s12  ;;  %p2150_p0 = scmp.lt.s32.totalorder %s2141_s12, %s2141_s12 }
  0x30   : > { %p2144_p7 = pnand %p2142_p4, %p2080_p13  ;;  %p2151_p5 = por %p2150_p0, %p2149_p11 }
  0x32   : > { %p2145_p8 = pneg %p2144_p7 }
  0x34   : > { %p2152_p6 = pnand %p2151_p5, %p2145_p8 }
  0x36   : > { %2155 = shalt.err (!%p2152_p6)
}
  0x37   : > { %1855 = dma.hbm_to_vmem [thread:$0]  (!%p2385_p12), %s2532_s7, 4096, %s345_s22, [#allocation6], %s2259_s25, %s2259_s25, %s2260_s30  }
  0x38   : > { %s2261_s19 = smov [#allocation8]  }
  0x39   : > { %s360_s15 = sshll.u32 %s2261_s19, 4  ;;  %s361_s15 = int_to_ptr.vmem [resolvable:$true] %s360_s15 }
  0x3a   : > { %s2167_s16 = scalar_lea.vmem %s361_s15, 2048  ;;  %p2175_p2 = scmp.lt.s32.totalorder %s361_s15, %s361_s15 }
  0x3b   : > { %p2168_p9 = scmp.ne.s32.totalorder %s361_s15, %s2167_s16  ;;  %p2176_p4 = scmp.lt.s32.totalorder %s2167_s16, %s2167_s16 }
  0x3d   : > { %p2170_p1 = pnand %p2168_p9, %p2080_p13  ;;  %p2177_p5 = por %p2176_p4, %p2175_p2 }
  0x3f   : > { %p2171_p3 = pneg %p2170_p1 }
  0x41   : > { %p2178_p7 = pnand %p2177_p5, %p2171_p3 }
  0x43   : > { %2181 = shalt.err (!%p2178_p7)
}
  0x44   : > { %s2262_s24 = smov 64   ;;  %s2263_s12 = smov 4  }
  0x45   : > { %1858 = dma.hbm_to_vmem [thread:$0]  (!%p2385_p12), %s2534_s9, 2048, %s361_s15, [#allocation9], %s2262_s24, %s2262_s24, %s2263_s12  }
  0x46   : > { %388 = sbr.rel (%p2377_p10) target bundleno = 1141 (0x475), region = 64  ;;  %p2546_p8 = scmp.eq.s32.totalorder (!%p2377_p10), %s2349_s21, 0 }
  0x4b   : > { %2225 = dma.done.wait (%p2546_p8), [#allocation3], 4096   ;;  %p2547_p13 = pmov %p2546_p8 }
  0x4c   : > { %p2548_p11 = pmov %p2546_p8 }
  0x4d   : > { %2227 = vsyncadd (%p2547_p13), [#allocation3], 4294963200 }
  0x4e   : > { %2229 = dma.done.wait (%p2548_p11), [#allocation6], 8192   ;;  %p2549_p0 = pmov %p2546_p8 }
  0x50   : > { %2231 = vsyncadd (%p2549_p0), [#allocation6], 4294959104  ;;  %p2550_p6 = pmov %p2549_p0 }
  0x51   : > { %p2551_p12 = pmov %p2549_p0 }
  0x52   : > { %2233 = dma.done.wait (%p2550_p6), [#allocation9], 2048  }
  0x53   : > { %2235 = vsyncadd (%p2551_p12), [#allocation9], 4294965248  ;;  %s1675_s29 = sshll.u32 %s2349_s21, 2  ;;  %v2264_v0 = vmov 0   ;;  %v1915_v1 = vld [vmem:[%s2526_s1 + $0x4] ss:$8 sps:$4 sm:$0xff]  }
  0x54   : > { %517 = vmatprep.mubr.bf16.mxu0 %v2264_v0  ;;  %p441_p10 = scmp.lt.s32.totalorder %s1675_s29, 7  ;;  %v1917_v2 = vld [vmem:[%s2526_s1] ss:$8 sps:$4 sm:$0xff]   ;;  %499 = vmatprep.subr.bf16.mxu0 %v1915_v1  ;;  %vm478_vm0 = vcmask 130048   ;;  %v1918_v6 = vld [vmem:[#allocation2 + $0x74] ss:$8 sps:$4 sm:$0xff]  }
  0x55   : > { %500 = vmatpush1.bf16.msra.mxu0 %v1917_v2  ;;  %v1920_v7 = vld [vmem:[#allocation2 + $0x70] ss:$8 sps:$4 sm:$0xff]   ;;  %v1921_v8 = vld [vmem:[#allocation2 + $0x64] ss:$8 sps:$4 sm:$0xff]   ;;  %754 = vmatprep.subr.bf16.mxu1 %v1918_v6  ;;  %v1923_v10 = vld [vmem:[#allocation2 + $0x60] ss:$8 sps:$4 sm:$0xff]  }
  0x56   : > { %s2561_s29 = smov (!%p441_p10, %s1675_s29), 7  ;;  %755 = vmatpush1.bf16.msra.mxu1 %v1920_v7  ;;  %v1924_v12 = vld [vmem:[#allocation2 + $0x54] ss:$8 sps:$4 sm:$0xff]   ;;  %v1926_v14 = vld [vmem:[#allocation2 + $0x50] ss:$8 sps:$4 sm:$0xff]   ;;  %s437_s19 = sand.u32 1, %s2246_s18  }
  0x57   : > { %s1676_s13 = sshll.u32 %s2561_s29, 3  ;;  %756 = vmatprep.subr.bf16.mxu1 %v1921_v8  ;;  %v1927_v15 = vld [vmem:[#allocation2 + $0x44] ss:$8 sps:$4 sm:$0xff]   ;;  %v1929_v16 = vld [vmem:[#allocation2 + $0x40] ss:$8 sps:$4 sm:$0xff]   ;;  %s1674_s15 = sshll.u32 %s437_s19, 5 }
  0x58   : > { %s444_s14 = scalar_lea.vmem %s2525_s0, %s1676_s13  ;;  %v1930_v17 = vld [vmem:[#allocation2 + $0x34] ss:$8 sps:$4 sm:$0xff]   ;;  %v1932_v18 = vld [vmem:[#allocation2 + $0x30] ss:$8 sps:$4 sm:$0xff]   ;;  %v1933_v19 = vld [vmem:[#allocation2 + $0x24] ss:$8 sps:$4 sm:$0xff]  }
  0x59   : > { %v448_v3 = vld [vmem:[%s444_s14] sm:$0xff]  ;;  %v449_v4 = vld [vmem:[%s444_s14 + $0x8] sm:$0xff]  ;;  %v450_v9 = vld [vmem:[%s444_s14 + $0x10] sm:$0xff]  ;;  %s439_s12 = scalar_lea.vmem [#allocation10], %s1674_s15  ;;  %s1799_s22 = sshll.u32 %s2349_s21, 9 }
  0x5a   : > { %v452_v5 = vpack.c.bf16 %v449_v4, %v448_v3  ;;  %v451_v11 = vld [vmem:[%s444_s14 + $0x18] sm:$0xff]  ;;  %757 = vmatpush1.bf16.msra.mxu1 %v1923_v10  ;;  %v1935_v20 = vld [vmem:[#allocation2 + $0x20] ss:$8 sps:$4 sm:$0xff]   ;;  %v1939_v23 = vld [vmem:[#allocation2 + $0x4] ss:$8 sps:$4 sm:$0xff]   ;;  %v458_v3 = vlaneseq  ;;  %s1559_s26 = sshll.u32 %s439_s12, 4  ;;  %s2483_s25 = scalar_lea.hbm %s2536_s11, %s1799_s22  ;;  %s2478_s26 = int_to_ptr.vmem [resolvable:$true] %s1559_s26 }
  0x5b   : > { %v453_v13 = vpack.c.bf16 %v451_v11, %v450_v9  ;;  %758 = vmatprep.subr.bf16.mxu1 %v1924_v12  ;;  %v1936_v21 = vld [vmem:[#allocation2 + $0x14] ss:$8 sps:$4 sm:$0xff]   ;;  %v1938_v22 = vld [vmem:[#allocation2 + $0x10] ss:$8 sps:$4 sm:$0xff]   ;;  %v1941_v24 = vld [vmem:[#allocation2] ss:$8 sps:$4 sm:$0xff]  }
  0x5c   : > { %1679 = vmatmul.mubr.msk.bf16.vlgmr.msra.gmra.mxu0 %vm478_vm0, %v452_v5  ;;  %v1942_v25 = vld [vmem:[#allocation2 + $0xf4] ss:$8 sps:$4 sm:$0xff]   ;;  %v1944_v26 = vld [vmem:[#allocation2 + $0xf0] ss:$8 sps:$4 sm:$0xff]   ;;  %v1945_v27 = vld [vmem:[#allocation2 + $0xe4] ss:$8 sps:$4 sm:$0xff]  }
  0x5d   : > { %527 = vmatprep.mubr.bf16.mxu0 %v2264_v0  ;;  %v1947_v28 = vld [vmem:[#allocation2 + $0xe0] ss:$8 sps:$4 sm:$0xff]   ;;  %v1948_v29 = vld [vmem:[#allocation2 + $0xd4] ss:$8 sps:$4 sm:$0xff]   ;;  %v1950_v30 = vld [vmem:[#allocation2 + $0xd0] ss:$8 sps:$4 sm:$0xff]  }
  0x5e   : > { %759 = vmatpush1.bf16.msra.mxu1 %v1926_v14  ;;  %v1951_v31 = vld [vmem:[#allocation2 + $0xc4] ss:$8 sps:$4 sm:$0xff]   ;;  %v1953_v32 = vld [vmem:[#allocation2 + $0xc0] ss:$8 sps:$4 sm:$0xff]   ;;  %v1954_v33 = vld [vmem:[#allocation2 + $0xb4] ss:$8 sps:$4 sm:$0xff]  }
  0x5f   : > { %760 = vmatprep.subr.bf16.mxu1 %v1927_v15  ;;  %v1956_v34 = vld [vmem:[#allocation2 + $0xb0] ss:$8 sps:$4 sm:$0xff]   ;;  %v1957_v35 = vld [vmem:[#allocation2 + $0xa4] ss:$8 sps:$4 sm:$0xff]   ;;  %v1959_v36 = vld [vmem:[#allocation2 + $0xa0] ss:$8 sps:$4 sm:$0xff]  }
  0x60   : > { %v1960_v37 = vld [vmem:[#allocation2 + $0x94] ss:$8 sps:$4 sm:$0xff]   ;;  %v1962_v38 = vld [vmem:[#allocation2 + $0x90] ss:$8 sps:$4 sm:$0xff]   ;;  %v1963_v39 = vld [vmem:[#allocation2 + $0x84] ss:$8 sps:$4 sm:$0xff]  }
  0x61   : > { %v1965_v40 = vld [vmem:[#allocation2 + $0x80] ss:$8 sps:$4 sm:$0xff]   ;;  %v1966_v41 = vld [vmem:[#allocation5 + $0x70] ss:$8 sps:$4 sm:$0xff]   ;;  %v1968_v42 = vld [vmem:[#allocation5 + $0x74] ss:$8 sps:$4 sm:$0xff]  }
  0x62   : > { %761 = vmatpush1.bf16.msra.mxu1 %v1929_v16  ;;  %v1971_v43 = vld [vmem:[#allocation5 + $0x64] ss:$8 sps:$4 sm:$0xff]   ;;  %1023 = vmatprep.subr.bf16.mxu0 %v1968_v42  ;;  %v1969_v44 = vld [vmem:[#allocation5 + $0x60] ss:$8 sps:$4 sm:$0xff]   ;;  %v1974_v45 = vld [vmem:[#allocation5 + $0x54] ss:$8 sps:$4 sm:$0xff]  }
  0x63   : > { %762 = vmatprep.subr.bf16.mxu1 %v1930_v17  ;;  %1024 = vmatpush1.bf16.msra.mxu0 %v1966_v41  ;;  %v1972_v46 = vld [vmem:[#allocation5 + $0x50] ss:$8 sps:$4 sm:$0xff]   ;;  %v1977_v47 = vld [vmem:[#allocation5 + $0x44] ss:$8 sps:$4 sm:$0xff]   ;;  %v1975_v48 = vld [vmem:[#allocation5 + $0x40] ss:$8 sps:$4 sm:$0xff]  }
  0x64   : > { %1680 = vmatmul.mubr.msk.bf16.gmra.mxu0 %vm478_vm0, %v453_v13  ;;  %1025 = vmatprep.subr.bf16.mxu0 %v1971_v43  ;;  %v1980_v49 = vld [vmem:[#allocation5 + $0x34] ss:$8 sps:$4 sm:$0xff]   ;;  %v1978_v50 = vld [vmem:[#allocation5 + $0x30] ss:$8 sps:$4 sm:$0xff]   ;;  %v1983_v51 = vld [vmem:[#allocation5 + $0x24] ss:$8 sps:$4 sm:$0xff]  }
  0x65   : > { %v1981_v52 = vld [vmem:[#allocation5 + $0x20] ss:$8 sps:$4 sm:$0xff]   ;;  %v1986_v53 = vld [vmem:[#allocation5 + $0x14] ss:$8 sps:$4 sm:$0xff]   ;;  %v1984_v54 = vld [vmem:[#allocation5 + $0x10] ss:$8 sps:$4 sm:$0xff]  }
  0x66   : > { %763 = vmatpush1.bf16.msra.mxu1 %v1932_v18  ;;  %v1989_v55 = vld [vmem:[#allocation5 + $0x4] ss:$8 sps:$4 sm:$0xff]   ;;  %v1987_v56 = vld [vmem:[#allocation5] ss:$8 sps:$4 sm:$0xff]   ;;  %v1992_v57 = vld [vmem:[#allocation5 + $0xf4] ss:$8 sps:$4 sm:$0xff]  }
  0x67   : > { %764 = vmatprep.subr.bf16.mxu1 %v1933_v19  ;;  %1026 = vmatpush1.bf16.msra.mxu0 %v1969_v44  ;;  %v1990_v58 = vld [vmem:[#allocation5 + $0xf0] ss:$8 sps:$4 sm:$0xff]   ;;  %v1995_v59 = vld [vmem:[#allocation5 + $0xe4] ss:$8 sps:$4 sm:$0xff]   ;;  %v1993_v60 = vld [vmem:[#allocation5 + $0xe0] ss:$8 sps:$4 sm:$0xff]  }
  0x68   : > { %1027 = vmatprep.subr.bf16.mxu0 %v1974_v45  ;;  %v1998_v61 = vld [vmem:[#allocation5 + $0xd4] ss:$8 sps:$4 sm:$0xff]   ;;  %v1996_v62 = vld [vmem:[#allocation5 + $0xd0] ss:$8 sps:$4 sm:$0xff]   ;;  %v2001_v63 = vld [vmem:[#allocation5 + $0xc4] ss:$8 sps:$4 sm:$0xff]  }
  0x69   : > { %v1999_v0 = vld [vmem:[#allocation5 + $0xc0] ss:$8 sps:$4 sm:$0xff]   ;;  %v2004_v1 = vld [vmem:[#allocation5 + $0xb4] ss:$8 sps:$4 sm:$0xff]   ;;  %v2002_v2 = vld [vmem:[#allocation5 + $0xb0] ss:$8 sps:$4 sm:$0xff]  }
  0x6a   : > { %765 = vmatpush1.bf16.msra.mxu1 %v1935_v20  ;;  %v459_v4 = vshrl.u32 %v458_v3, 7  ;;  %v456_v7 = vld [vmem:[%s2527_s2] sm:$0x3]  ;;  %v2008_v41 = vld [vmem:[#allocation5 + $0x90] ss:$8 sps:$4 sm:$0xff]   ;;  %s2485_s30 = scalar_lea.sflag [#allocation4], %s437_s19 }
  0x6b   : > { %766 = vmatprep.subr.bf16.mxu1 %v1936_v21  ;;  %1028 = vmatpush1.bf16.msra.mxu0 %v1972_v46  ;;  %v2013_v42 = vld [vmem:[#allocation5 + $0x84] ss:$8 sps:$4 sm:$0xff]   ;;  %v2011_v43 = vld [vmem:[#allocation5 + $0x80] ss:$8 sps:$4 sm:$0xff]   ;;  %v2014_v44 = vld [vmem:[#allocation7 + $0x70] ss:$8 sps:$4 sm:$0xff]  }
  0x6c   : > { %1029 = vmatprep.subr.bf16.mxu0 %v1977_v47  ;;  %v2449_v5 = vsub.s32 1, %v459_v4  ;;  %v2451_v6 = vsub.s32 0, %v459_v4  ;;  %v2016_v45 = vld [vmem:[#allocation7 + $0x74] ss:$8 sps:$4 sm:$0xff]   ;;  %v2019_v46 = vld [vmem:[#allocation7 + $0x64] ss:$8 sps:$4 sm:$0xff]  }
  0x6d   : > { %v2017_v47 = vld [vmem:[#allocation7 + $0x60] ss:$8 sps:$4 sm:$0xff]   ;;  %v2052_v4 = vld [vmem:[#allocation7 + $0xb4] ss:$8 sps:$4 sm:$0xff]   ;;  %s2182_s14 = scalar_lea.vmem %s2478_s26, 512  ;;  %p2552_p1 = scmp.ne.s32.totalorder %s2542_s27, 0 }
  0x6e   : > { %767 = vmatpush1.bf16.msra.mxu1 %v1938_v22  ;;  %v465_v9 = vrot.slane %v456_v7, %v2449_v5  ;;  %v461_v10 = vrot.slane %v456_v7, %v2451_v6  ;;  %v2047_v3 = vld [vmem:[#allocation7 + $0xc0] ss:$8 sps:$4 sm:$0xff]   ;;  %v2050_v7 = vld [vmem:[#allocation7 + $0xb0] ss:$8 sps:$4 sm:$0xff]   ;;  %p2183_p9 = scmp.ne.s32.totalorder %s2478_s26, %s2182_s14  ;;  %s2265_s21 = smov [#allocation10]  }
  0x6f   : > { %768 = vmatprep.subr.bf16.mxu1 %v1939_v23  ;;  %1030 = vmatpush1.bf16.msra.mxu0 %v1975_v48  ;;  %v2022_v48 = vld [vmem:[#allocation7 + $0x54] ss:$8 sps:$4 sm:$0xff]   ;;  %s2186_s15 = sshll.u32 %s2265_s21, 4  ;;  %s2187_s15 = int_to_ptr.vmem [resolvable:$false] %s2186_s15 }
  0x70   : > { %1031 = vmatprep.subr.bf16.mxu0 %v1980_v49  ;;  %v2020_v49 = vld [vmem:[#allocation7 + $0x50] ss:$8 sps:$4 sm:$0xff]   ;;  %p2184_p3 = pnand %p2183_p9, %p2552_p1  ;;  %s2188_s16 = scalar_lea.vmem %s2187_s15, 1024 }
  0x71   : > { %p2189_p4 = scmp.lt.s32.totalorder %s2478_s26, %s2187_s15  ;;  %p2190_p5 = scmp.lt.s32.totalorder %s2188_s16, %s2182_s14 }
  0x72   : > { %769 = vmatpush1.bf16.msra.mxu1 %v1941_v24  ;;  %p2185_p2 = pneg %p2184_p3 }
  0x73   : > { %770 = vmatprep.subr.bf16.mxu1 %v1942_v25  ;;  %1032 = vmatpush1.bf16.msra.mxu0 %v1978_v50  ;;  %v2025_v50 = vld [vmem:[#allocation7 + $0x44] ss:$8 sps:$4 sm:$0xff]   ;;  %p2191_p7 = por %p2190_p5, %p2189_p4 }
  0x74   : > { %1033 = vmatprep.subr.bf16.mxu0 %v1983_v51  ;;  %v2023_v51 = vld [vmem:[#allocation7 + $0x40] ss:$8 sps:$4 sm:$0xff]  }
  0x75   : > { %p2192_p8 = pnand %p2191_p7, %p2185_p2 }
  0x76   : > { %771 = vmatpush2.bf16.msra.mxu1 %v1944_v26 }
  0x77   : > { %772 = vmatprep.subr.bf16.mxu1 %v1945_v27  ;;  %1034 = vmatpush1.bf16.msra.mxu0 %v1981_v52  ;;  %v2028_v52 = vld [vmem:[#allocation7 + $0x34] ss:$8 sps:$4 sm:$0xff]  }
  0x78   : > { %1035 = vmatprep.subr.bf16.mxu0 %v1986_v53  ;;  %v2026_v53 = vld [vmem:[#allocation7 + $0x30] ss:$8 sps:$4 sm:$0xff]  }
  0x7a   : > { %773 = vmatpush2.bf16.msra.mxu1 %v1947_v28 }
  0x7b   : > { %774 = vmatprep.subr.bf16.mxu1 %v1948_v29  ;;  %1036 = vmatpush1.bf16.msra.mxu0 %v1984_v54  ;;  %v2031_v54 = vld [vmem:[#allocation7 + $0x24] ss:$8 sps:$4 sm:$0xff]  }
  0x7c   : > { %1037 = vmatprep.subr.bf16.mxu0 %v1989_v55  ;;  %v2029_v55 = vld [vmem:[#allocation7 + $0x20] ss:$8 sps:$4 sm:$0xff]  }
  0x7e   : > { %775 = vmatpush2.bf16.msra.mxu1 %v1950_v30 }
  0x7f   : > { %776 = vmatprep.subr.bf16.mxu1 %v1951_v31  ;;  %1038 = vmatpush1.bf16.msra.mxu0 %v1987_v56  ;;  %v2034_v56 = vld [vmem:[#allocation7 + $0x14] ss:$8 sps:$4 sm:$0xff]  }
  0x80   : > { %1039 = vmatprep.subr.bf16.mxu0 %v1992_v57  ;;  %v2032_v57 = vld [vmem:[#allocation7 + $0x10] ss:$8 sps:$4 sm:$0xff]  }
  0x82   : > { %777 = vmatpush2.bf16.msra.mxu1 %v1953_v32 }
  0x83   : > { %778 = vmatprep.subr.bf16.mxu1 %v1954_v33  ;;  %1040 = vmatpush2.bf16.msra.mxu0 %v1990_v58  ;;  %v2037_v58 = vld [vmem:[#allocation7 + $0x4] ss:$8 sps:$4 sm:$0xff]  }
  0x84   : > { %1041 = vmatprep.subr.bf16.mxu0 %v1995_v59  ;;  %v2035_v59 = vld [vmem:[#allocation7] ss:$8 sps:$4 sm:$0xff]  }
  0x86   : > { %779 = vmatpush2.bf16.msra.mxu1 %v1956_v34 }
  0x87   : > { %780 = vmatprep.subr.bf16.mxu1 %v1957_v35  ;;  %1042 = vmatpush2.bf16.msra.mxu0 %v1993_v60  ;;  %v2040_v60 = vld [vmem:[#allocation7 + $0xf4] ss:$8 sps:$4 sm:$0xff]  }
  0x88   : > { %1043 = vmatprep.subr.bf16.mxu0 %v1998_v61  ;;  %v2038_v61 = vld [vmem:[#allocation7 + $0xf0] ss:$8 sps:$4 sm:$0xff]  }
  0x8a   : > { %781 = vmatpush2.bf16.msra.mxu1 %v1959_v36 }
  0x8b   : > { %782 = vmatprep.subr.bf16.mxu1 %v1960_v37  ;;  %1044 = vmatpush2.bf16.msra.mxu0 %v1996_v62  ;;  %v2043_v62 = vld [vmem:[#allocation7 + $0xe4] ss:$8 sps:$4 sm:$0xff]  }
  0x8c   : > { %1045 = vmatprep.subr.bf16.mxu0 %v2001_v63  ;;  %v2041_v63 = vld [vmem:[#allocation7 + $0xe0] ss:$8 sps:$4 sm:$0xff]  }
  0x8e   : > { %783 = vmatpush2.bf16.msra.mxu1 %v1962_v38  ;;  %v2007_v38 = vld [vmem:[#allocation5 + $0xa4] ss:$8 sps:$4 sm:$0xff]  }
  0x8f   : > { %784 = vmatprep.subr.bf16.mxu1 %v1963_v39  ;;  %1046 = vmatpush2.bf16.msra.mxu0 %v1999_v0  ;;  %v2005_v39 = vld [vmem:[#allocation5 + $0xa0] ss:$8 sps:$4 sm:$0xff]   ;;  %v2046_v0 = vld [vmem:[#allocation7 + $0xd4] ss:$8 sps:$4 sm:$0xff]  }
  0x90   : > { %1047 = vmatprep.subr.bf16.mxu0 %v2004_v1  ;;  %v2044_v1 = vld [vmem:[#allocation7 + $0xd0] ss:$8 sps:$4 sm:$0xff]  }
  0x92   : > { %785 = vmatpush2.bf16.msra.mxu1 %v1965_v40  ;;  %v2010_v40 = vld [vmem:[#allocation5 + $0x94] ss:$8 sps:$4 sm:$0xff]  }
  0x93   : > { %1048 = vmatpush2.bf16.msra.mxu0 %v2002_v2  ;;  %1292 = vmatprep.subr.bf16.mxu1 %v2016_v45  ;;  %v2049_v2 = vld [vmem:[#allocation7 + $0xc4] ss:$8 sps:$4 sm:$0xff]   ;;  %v2062_v45 = vld [vmem:[#allocation8 + $0x78] sm:$0xff]  }
  0x94   : > { %1049 = vmatprep.subr.bf16.mxu0 %v2007_v38 }
  0x97   : > { %1050 = vmatpush2.bf16.msra.mxu0 %v2005_v39  ;;  %v2055_v39 = vld [vmem:[#allocation7 + $0xa4] ss:$8 sps:$4 sm:$0xff]  }
  0x98   : > { %1051 = vmatprep.subr.bf16.mxu0 %v2010_v40  ;;  %v2053_v40 = vld [vmem:[#allocation7 + $0xa0] ss:$8 sps:$4 sm:$0xff]  }
  0x9b   : > { %1052 = vmatpush2.bf16.msra.mxu0 %v2008_v41  ;;  %v2058_v41 = vld [vmem:[#allocation7 + $0x94] ss:$8 sps:$4 sm:$0xff]  }
  0x9c   : > { %1053 = vmatprep.subr.bf16.mxu0 %v2013_v42  ;;  %v2056_v42 = vld [vmem:[#allocation7 + $0x90] ss:$8 sps:$4 sm:$0xff]  }
  0x9f   : > { %1054 = vmatpush2.bf16.msra.mxu0 %v2011_v43  ;;  %v2061_v43 = vld [vmem:[#allocation7 + $0x84] ss:$8 sps:$4 sm:$0xff]  }
  0xa0   : > { %1800 = vmatprep.subr.bf16.mxu0 %v2062_v45 }
 0x11c   : > { %v519_v8 = vpop.f32.mrf.mxu0 }
 0x11d   : > { %v520_v15 = vadd.f32 %v519_v8, %v461_v10  ;;  %v582_v8 = vld [vmem:[%s2529_s4] sm:$0x3] }
 0x11e   : > { %v521_v11 = vpop.f32.mrf.mxu0 }
 0x11f   : > { %v522_v13 = vadd.f32 %v521_v11, %v465_v9  ;;  %v538_v22 = vmax.f32 %v520_v15, 0.0  ;;  %v587_v11 = vrot.slane %v582_v8, %v2451_v6 }
 0x120   : > { %v523_v12 = vpop.f32.mrf.mxu0 }
 0x121   : > { %v524_v14 = vadd.f32 %v523_v12, %v461_v10  ;;  %v539_v20 = vmax.f32 %v522_v13, 0.0 }
 0x122   : > { %v525_v16 = vpop.f32.mrf.mxu0 }
 0x123   : > { %v526_v17 = vadd.f32 %v525_v16, %v465_v9  ;;  %v540_v18 = vmax.f32 %v524_v14, 0.0 }
 0x124   : > { %v529_v19 = vpop.f32.mrf.mxu0 }
 0x125   : > { %v541_v21 = vmax.f32 %v526_v17, 0.0  ;;  %v546_v25 = vpack.c.bf16 %v540_v18, %v538_v22  ;;  %v530_v29 = vadd.f32 %v529_v19, %v461_v10 }
 0x126   : > { %v531_v23 = vpop.f32.mrf.mxu0 }
 0x127   : > { %v547_v24 = vpack.c.bf16 %v541_v21, %v539_v20  ;;  %v532_v27 = vadd.f32 %v531_v23, %v465_v9  ;;  %v542_v35 = vmax.f32 %v530_v29, 0.0 }
 0x128   : > { %v533_v26 = vpop.f32.mrf.mxu0 }
 0x129   : > { %v534_v28 = vadd.f32 %v533_v26, %v461_v10  ;;  %786 = vmatprep.mubr.bf16.mxu1 %v547_v24  ;;  %v543_v33 = vmax.f32 %v532_v27, 0.0  ;;  %v591_v10 = vrot.slane %v582_v8, %v2449_v5 }
 0x12a   : > { %v535_v30 = vpop.f32.mrf.mxu0  ;;  %787 = vmatmul.mubr.bf16.vlgmr.msra.gmra.mxu1 %v546_v25 }
 0x12b   : > { %v536_v31 = vadd.f32 %v535_v30, %v465_v9  ;;  %v544_v32 = vmax.f32 %v534_v28, 0.0  ;;  %1293 = vmatpush1.bf16.msra.mxu1 %v2014_v44  ;;  %v2059_v44 = vld [vmem:[#allocation7 + $0x80] ss:$8 sps:$4 sm:$0xff]  }
 0x12c   : > { %1294 = vmatprep.subr.bf16.mxu1 %v2019_v46  ;;  %v2063_v46 = vld [vmem:[#allocation8 + $0x38] sm:$0xff]  }
 0x12d   : > { %v545_v34 = vmax.f32 %v536_v31, 0.0  ;;  %v548_v37 = vpack.c.bf16 %v544_v32, %v542_v35 }
 0x12f   : > { %v549_v36 = vpack.c.bf16 %v545_v34, %v543_v33  ;;  %1295 = vmatpush1.bf16.msra.mxu1 %v2017_v47  ;;  %v2064_v47 = vld [vmem:[#allocation8 + $0x70] sm:$0xff]  }
 0x130   : > { %1296 = vmatprep.subr.bf16.mxu1 %v2022_v48  ;;  %v2065_v48 = vld [vmem:[#allocation8 + $0x30] sm:$0xff]  }
 0x131   : > { %796 = vmatprep.mubr.bf16.mxu1 %v549_v36 }
 0x132   : > { %797 = vmatmul.mubr.bf16.gmra.mxu1 %v548_v37 }
 0x133   : > { %1297 = vmatpush1.bf16.msra.mxu1 %v2020_v49  ;;  %v2066_v49 = vld [vmem:[#allocation8 + $0x68] sm:$0xff]  }
 0x134   : > { %1298 = vmatprep.subr.bf16.mxu1 %v2025_v50  ;;  %v2067_v50 = vld [vmem:[#allocation8 + $0x28] sm:$0xff]  }
 0x137   : > { %1299 = vmatpush1.bf16.msra.mxu1 %v2023_v51  ;;  %v2068_v51 = vld [vmem:[#allocation8 + $0x60] sm:$0xff]  }
 0x138   : > { %1300 = vmatprep.subr.bf16.mxu1 %v2028_v52  ;;  %v2069_v52 = vld [vmem:[#allocation8 + $0x20] sm:$0xff]  }
 0x13b   : > { %1301 = vmatpush1.bf16.msra.mxu1 %v2026_v53  ;;  %v2070_v53 = vld [vmem:[#allocation8 + $0x58] sm:$0xff]  }
 0x13c   : > { %1302 = vmatprep.subr.bf16.mxu1 %v2031_v54  ;;  %v2071_v54 = vld [vmem:[#allocation8 + $0x18] sm:$0xff]  }
 0x13f   : > { %1303 = vmatpush1.bf16.msra.mxu1 %v2029_v55  ;;  %v851_v55 = vld [vmem:[%s2531_s6] sm:$0x3] }
 0x140   : > { %1304 = vmatprep.subr.bf16.mxu1 %v2034_v56 }
 0x143   : > { %1305 = vmatpush1.bf16.msra.mxu1 %v2032_v57  ;;  %v860_v57 = vrot.slane %v851_v55, %v2449_v5 }
 0x144   : > { %1306 = vmatprep.subr.bf16.mxu1 %v2037_v58  ;;  %v856_v58 = vrot.slane %v851_v55, %v2451_v6 }
 0x147   : > { %1307 = vmatpush1.bf16.msra.mxu1 %v2035_v59 }
 0x148   : > { %1308 = vmatprep.subr.bf16.mxu1 %v2040_v60 }
 0x14b   : > { %1309 = vmatpush2.bf16.msra.mxu1 %v2038_v61 }
 0x14c   : > { %1310 = vmatprep.subr.bf16.mxu1 %v2043_v62 }
 0x14f   : > { %1311 = vmatpush2.bf16.msra.mxu1 %v2041_v63 }
 0x150   : > { %1312 = vmatprep.subr.bf16.mxu1 %v2046_v0 }
 0x153   : > { %1313 = vmatpush2.bf16.msra.mxu1 %v2044_v1 }
 0x154   : > { %1314 = vmatprep.subr.bf16.mxu1 %v2049_v2 }
 0x157   : > { %1315 = vmatpush2.bf16.msra.mxu1 %v2047_v3 }
 0x158   : > { %1316 = vmatprep.subr.bf16.mxu1 %v2052_v4 }
 0x15b   : > { %1317 = vmatpush2.bf16.msra.mxu1 %v2050_v7 }
 0x15c   : > { %1318 = vmatprep.subr.bf16.mxu1 %v2055_v39 }
 0x15f   : > { %1319 = vmatpush2.bf16.msra.mxu1 %v2053_v40 }
 0x160   : > { %1320 = vmatprep.subr.bf16.mxu1 %v2058_v41 }
 0x163   : > { %1321 = vmatpush2.bf16.msra.mxu1 %v2056_v42 }
 0x164   : > { %1322 = vmatprep.subr.bf16.mxu1 %v2061_v43 }
 0x167   : > { %1323 = vmatpush2.bf16.msra.mxu1 %v2059_v44 }
 0x1ea   : > { %v788_v9 = vpop.f32.mrf.mxu1 }
 0x1eb   : > { %v789_v16 = vadd.f32 %v788_v9, %v587_v11 }
 0x1ec   : > { %v790_v12 = vpop.f32.mrf.mxu1 }
 0x1ed   : > { %v791_v14 = vadd.f32 %v790_v12, %v591_v10  ;;  %v807_v23 = vmax.f32 %v789_v16, 0.0 }
 0x1ee   : > { %v792_v13 = vpop.f32.mrf.mxu1 }
 0x1ef   : > { %v793_v15 = vadd.f32 %v792_v13, %v587_v11  ;;  %v808_v21 = vmax.f32 %v791_v14, 0.0 }
 0x1f0   : > { %v794_v17 = vpop.f32.mrf.mxu1 }
 0x1f1   : > { %v795_v18 = vadd.f32 %v794_v17, %v591_v10  ;;  %v809_v19 = vmax.f32 %v793_v15, 0.0 }
 0x1f2   : > { %v798_v20 = vpop.f32.mrf.mxu1 }
 0x1f3   : > { %v810_v22 = vmax.f32 %v795_v18, 0.0  ;;  %v815_v26 = vpack.c.bf16 %v809_v19, %v807_v23  ;;  %v799_v30 = vadd.f32 %v798_v20, %v587_v11 }
 0x1f4   : > { %v800_v24 = vpop.f32.mrf.mxu1 }
 0x1f5   : > { %v816_v25 = vpack.c.bf16 %v810_v22, %v808_v21  ;;  %v801_v28 = vadd.f32 %v800_v24, %v591_v10  ;;  %v811_v36 = vmax.f32 %v799_v30, 0.0  ;;  %v2072_v24 = vld [vmem:[#allocation8 + $0x50] sm:$0xff]   ;;  %v1120_v30 = vld [vmem:[%s2533_s8] sm:$0x3] }
 0x1f6   : > { %v802_v27 = vpop.f32.mrf.mxu1 }
 0x1f7   : > { %v803_v29 = vadd.f32 %v802_v27, %v587_v11  ;;  %1055 = vmatprep.mubr.bf16.mxu0 %v816_v25  ;;  %v812_v34 = vmax.f32 %v801_v28, 0.0  ;;  %v2073_v25 = vld [vmem:[#allocation8 + $0x10] sm:$0xff]   ;;  %v2075_v27 = vld [vmem:[#allocation8 + $0x8] sm:$0xff]   ;;  %v2076_v28 = vld [vmem:[#allocation8 + $0x40] sm:$0xff]  }
 0x1f8   : > { %v804_v31 = vpop.f32.mrf.mxu1  ;;  %1056 = vmatmul.mubr.bf16.vlgmr.msra.gmra.mxu0 %v815_v26  ;;  %v2074_v26 = vld [vmem:[#allocation8 + $0x48] sm:$0xff]  }
 0x1f9   : > { %v805_v32 = vadd.f32 %v804_v31, %v591_v10  ;;  %v813_v33 = vmax.f32 %v803_v29, 0.0  ;;  %1801 = vmatpush3.bf16.msra.mxu0 %v2063_v46  ;;  %v2077_v29 = vld [vmem:[#allocation8] sm:$0xff]  }
 0x1fa   : > { %1802 = vmatprep.subr.bf16.mxu0 %v2064_v47 }
 0x1fb   : > { %v814_v35 = vmax.f32 %v805_v32, 0.0  ;;  %v817_v38 = vpack.c.bf16 %v813_v33, %v811_v36  ;;  %v1129_v32 = vrot.slane %v1120_v30, %v2449_v5  ;;  %v1125_v33 = vrot.slane %v1120_v30, %v2451_v6 }
 0x1fd   : > { %v818_v37 = vpack.c.bf16 %v814_v35, %v812_v34  ;;  %1803 = vmatpush3.bf16.msra.mxu0 %v2065_v48 }
 0x1fe   : > { %1804 = vmatprep.subr.bf16.mxu0 %v2066_v49 }
 0x1ff   : > { %1065 = vmatprep.mubr.bf16.mxu0 %v818_v37 }
 0x200   : > { %1066 = vmatmul.mubr.bf16.gmra.mxu0 %v817_v38 }
 0x201   : > { %1805 = vmatpush3.bf16.msra.mxu0 %v2067_v50 }
 0x202   : > { %1806 = vmatprep.subr.bf16.mxu0 %v2068_v51 }
 0x205   : > { %1807 = vmatpush3.bf16.msra.mxu0 %v2069_v52 }
 0x206   : > { %1808 = vmatprep.subr.bf16.mxu0 %v2070_v53 }
 0x209   : > { %1809 = vmatpush3.bf16.msra.mxu0 %v2071_v54 }
 0x20a   : > { %1810 = vmatprep.subr.bf16.mxu0 %v2072_v24 }
 0x20d   : > { %1811 = vmatpush3.bf16.msra.mxu0 %v2073_v25 }
 0x20e   : > { %1812 = vmatprep.subr.bf16.mxu0 %v2074_v26 }
 0x211   : > { %1813 = vmatpush3.bf16.msra.mxu0 %v2075_v27 }
 0x212   : > { %1814 = vmatprep.subr.bf16.mxu0 %v2076_v28 }
 0x215   : > { %1815 = vmatpush3.bf16.msra.mxu0 %v2077_v29 }
 0x2b8   : > { %v1057_v56 = vpop.f32.mrf.mxu0 }
 0x2b9   : > { %v1058_v63 = vadd.f32 %v1057_v56, %v856_v58 }
 0x2ba   : > { %v1059_v59 = vpop.f32.mrf.mxu0 }
 0x2bb   : > { %v1060_v61 = vadd.f32 %v1059_v59, %v860_v57  ;;  %v1076_v8 = vmax.f32 %v1058_v63, 0.0 }
 0x2bc   : > { %v1061_v60 = vpop.f32.mrf.mxu0 }
 0x2bd   : > { %v1062_v62 = vadd.f32 %v1061_v60, %v856_v58  ;;  %v1077_v4 = vmax.f32 %v1060_v61, 0.0  ;;  %v1777_v60 = vld [vmem:[%s2535_s10] ss:$0 sm:$0xff] }
 0x2be   : > { %v1063_v0 = vpop.f32.mrf.mxu0 }
 0x2bf   : > { %v1064_v1 = vadd.f32 %v1063_v0, %v860_v57  ;;  %v1078_v2 = vmax.f32 %v1062_v62, 0.0 }
 0x2c0   : > { %v1067_v3 = vpop.f32.mrf.mxu0 }
 0x2c1   : > { %v1079_v7 = vmax.f32 %v1064_v1, 0.0  ;;  %v1084_v11 = vpack.c.bf16 %v1078_v2, %v1076_v8  ;;  %v1068_v15 = vadd.f32 %v1067_v3, %v856_v58 }
 0x2c2   : > { %v1069_v9 = vpop.f32.mrf.mxu0 }
 0x2c3   : > { %v1085_v10 = vpack.c.bf16 %v1079_v7, %v1077_v4  ;;  %v1070_v13 = vadd.f32 %v1069_v9, %v860_v57  ;;  %v1080_v21 = vmax.f32 %v1068_v15, 0.0 }
 0x2c4   : > { %v1071_v12 = vpop.f32.mrf.mxu0 }
 0x2c5   : > { %v1072_v14 = vadd.f32 %v1071_v12, %v856_v58  ;;  %1324 = vmatprep.mubr.bf16.mxu1 %v1085_v10  ;;  %v1081_v19 = vmax.f32 %v1070_v13, 0.0 }
 0x2c6   : > { %v1073_v16 = vpop.f32.mrf.mxu0  ;;  %1325 = vmatmul.mubr.bf16.vlgmr.msra.gmra.mxu1 %v1084_v11 }
 0x2c7   : > { %v1074_v17 = vadd.f32 %v1073_v16, %v860_v57  ;;  %v1082_v18 = vmax.f32 %v1072_v14, 0.0 }
 0x2c9   : > { %v1083_v20 = vmax.f32 %v1074_v17, 0.0  ;;  %v1086_v23 = vpack.c.bf16 %v1082_v18, %v1080_v21 }
 0x2cb   : > { %v1087_v22 = vpack.c.bf16 %v1083_v20, %v1081_v19 }
 0x2cd   : > { %1334 = vmatprep.mubr.bf16.mxu1 %v1087_v22 }
 0x2ce   : > { %1335 = vmatmul.mubr.bf16.gmra.mxu1 %v1086_v23 }
 0x386   : > { %v1326_v31 = vpop.f32.mrf.mxu1 }
 0x387   : > { %v1327_v38 = vadd.f32 %v1326_v31, %v1125_v33 }
 0x388   : > { %v1328_v34 = vpop.f32.mrf.mxu1 }
 0x389   : > { %v1329_v36 = vadd.f32 %v1328_v34, %v1129_v32  ;;  %v1345_v45 = vmax.f32 %v1327_v38, 0.0 }
 0x38a   : > { %v1330_v35 = vpop.f32.mrf.mxu1 }
 0x38b   : > { %v1331_v37 = vadd.f32 %v1330_v35, %v1125_v33  ;;  %v1346_v43 = vmax.f32 %v1329_v36, 0.0 }
 0x38c   : > { %v1332_v39 = vpop.f32.mrf.mxu1 }
 0x38d   : > { %v1333_v40 = vadd.f32 %v1332_v39, %v1129_v32  ;;  %v1347_v41 = vmax.f32 %v1331_v37, 0.0 }
 0x38e   : > { %v1336_v42 = vpop.f32.mrf.mxu1 }
 0x38f   : > { %v1348_v44 = vmax.f32 %v1333_v40, 0.0  ;;  %v1353_v48 = vpack.c.bf16 %v1347_v41, %v1345_v45  ;;  %v1337_v6 = vadd.f32 %v1336_v42, %v1125_v33 }
 0x390   : > { %v1338_v46 = vpop.f32.mrf.mxu1 }
 0x391   : > { %v1354_v47 = vpack.c.bf16 %v1348_v44, %v1346_v43  ;;  %v1339_v5 = vadd.f32 %v1338_v46, %v1129_v32  ;;  %v1349_v56 = vmax.f32 %v1337_v6, 0.0 }
 0x392   : > { %v1340_v49 = vpop.f32.mrf.mxu1 }
 0x393   : > { %v1341_v50 = vadd.f32 %v1340_v49, %v1125_v33  ;;  %1524 = vmatprep.mubr.bf16.mxu0 %v1354_v47  ;;  %v1350_v54 = vmax.f32 %v1339_v5, 0.0 }
 0x394   : > { %v1342_v51 = vpop.f32.mrf.mxu1  ;;  %1525 = vmatmul.mubr.bf16.vlgmr.msra.gmra.mxu0 %v1353_v48 }
 0x395   : > { %v1343_v52 = vadd.f32 %v1342_v51, %v1129_v32  ;;  %v1351_v53 = vmax.f32 %v1341_v50, 0.0 }
 0x397   : > { %v1352_v55 = vmax.f32 %v1343_v52, 0.0  ;;  %v1355_v58 = vpack.c.bf16 %v1351_v53, %v1349_v56 }
 0x399   : > { %v1356_v57 = vpack.c.bf16 %v1352_v55, %v1350_v54 }
 0x39b   : > { %1532 = vmatprep.mubr.bf16.mxu0 %v1356_v57 }
 0x39c   : > { %1533 = vmatmul.mubr.bf16.gmra.mxu0 %v1355_v58 }
 0x454   : > { %v1816_v59 = vpop.f32.mrf.mxu0 }
 0x456   : > { %v1817_v61 = vpop.f32.mrf.mxu0 }
 0x457   : > { %v1818_v62 = vadd.f32 %v1817_v61, %v1816_v59 }
 0x458   : > { %v1819_v63 = vpop.f32.mrf.mxu0 }
 0x459   : > { %v1527_v0 = vadd.f32 %v1818_v62, %v1777_v60 }
 0x45a   : > { %v1820_v1 = vpop.f32.mrf.mxu0 }
 0x45b   : > { %1541 = vst [vmem:[%s439_s12] sm:$0xff] %v1527_v0  ;;  %v1821_v2 = vadd.f32 %v1820_v1, %v1819_v63 }
 0x45c   : > { %v1822_v3 = vpop.f32.mrf.mxu0 }
 0x45d   : > { %v1530_v4 = vadd.f32 %v1821_v2, %v1777_v60 }
 0x45e   : > { %v1823_v7 = vpop.f32.mrf.mxu0 }
 0x45f   : > { %1542 = vst [vmem:[%s439_s12 + $0x8] sm:$0xff] %v1530_v4  ;;  %v1824_v8 = vadd.f32 %v1823_v7, %v1822_v3 }
 0x460   : > { %v1825_v9 = vpop.f32.mrf.mxu0 }
 0x461   : > { %v1535_v10 = vadd.f32 %v1824_v8, %v1777_v60 }
 0x462   : > { %v1826_v11 = vpop.f32.mrf.mxu0 }
 0x463   : > { %1543 = vst [vmem:[%s439_s12 + $0x10] sm:$0xff] %v1535_v10  ;;  %v1827_v12 = vadd.f32 %v1826_v11, %v1825_v9 }
 0x465   : > { %v1538_v13 = vadd.f32 %v1827_v12, %v1777_v60 }
 0x467   : > { %1544 = vst [vmem:[%s439_s12 + $0x18] sm:$0xff] %v1538_v13 }
 0x468   : > { %2195 = shalt.err (!%p2192_p8)
}
 0x469   : > { %s2196_s19 = scalar_lea.hbm %s2483_s25, 512  ;;  %s2200_s22 = scalar_lea.hbm %s2536_s11, 1024 }
 0x46a   : > { %p2197_p13 = scmp.ne.s32.totalorder %s2483_s25, %s2196_s19  ;;  %p2201_p6 = scmp.lt.s32.totalorder %s2483_s25, %s2536_s11 }
 0x46b   : > { %p2202_p12 = scmp.lt.s32.totalorder %s2200_s22, %s2196_s19 }
 0x46c   : > { %p2198_p11 = pnand %p2197_p13, %p2552_p1 }
 0x46d   : > { %p2203_p10 = por %p2202_p12, %p2201_p6 }
 0x46e   : > { %p2199_p0 = pneg %p2198_p11 }
 0x470   : > { %p2204_p9 = pnand %p2203_p10, %p2199_p0 }
 0x472   : > { %2207 = shalt.err (!%p2204_p9)
}
 0x473   : > { %s2266_s14 = smov 128   ;;  %s2267_s21 = smov 8  }
 0x474   : > { %1844 = dma.vmem_to_hbm [thread:$0]  (%p2552_p1), %s2478_s26, 512, %s2483_s25, %s2485_s30, %s2266_s14, %s2266_s14, %s2267_s21  }
 0x475 PF: > { %p1871_p3 = scmp.ge.s32.totalorder %s2254_s20, 2  ;;  %s1574_s15 = sand.u32 1, %s2242_s17  }
 0x476   : > { %p2553_p2 = scmp.ne.s32.totalorder %s2543_s28, 0  ;;  %s1575_s16 = scalar_lea.sflag [#allocation4], %s1574_s15 }
 0x478   : > { %p1860_p4 = pnand %p1871_p3, %p2553_p2 }
 0x47a   : > { %p1861_p5 = pneg %p1860_p4 }
 0x47c   : > { %2237 = dma.done.wait (%p1861_p5), %s1575_s16, 512  }
 0x47d   : > { %2239 = vsyncadd (%p1861_p5), %s1575_s16, 4294966784  ;;  %s2554_s19 = sld [smem:[#allocation15_spill]]  ;;  %p24_p7 = scmp.ge.s32.totalorder %s2353_s23, 4  }
 0x47e   : > { %s2555_s24 = sld [smem:[#allocation16_spill]]  ;;  %s2556_s17 = smov %s2246_s18 }
 0x47f   : > { %s2559_s20 = smov %s2353_s23 }
 0x480   :  { %26 = sbr.rel (!%p24_p7) target bundleno = 6 (0x6), region = 116 }
 0x483   : > { %s2557_s18 = smov %s2554_s19 }
 0x484   : > { %s2558_s19 = smov %s2555_s24 }
 0x485   :  { %1580 = vsyncpa [#allocation3], 1 }
 0x486   :  { %1582 = vsyncpa [#allocation3 + $0x1], 1 }
 0x487   :  { %1583 = vsyncpa [#allocation6], 1 }
 0x488   :  { %1584 = vsyncpa [#allocation9], 1 }
 0x489   :  { %1585 = vsyncpa [#allocation4], 1 }
 0x48a   :  { %1587 = vsyncpa [#allocation4 + $0x1], 1 }

</bundles_post_ra>
